<compile_context>
chip_gen: v7x
topology: tpu7x:2x2x1
jax: 0.10.0
libtpu: 0.0.40
codegen_flags: <defaults>
</compile_context>

<pallas_src>
import jax
import jax.numpy as jnp
import numpy as np
from jax.experimental import pallas as pl
from jax.experimental.pallas import tpu as pltpu

OUT_PAD = 128  # lane-dense padded width of the final (10-wide) layer


def mlp_kernel(x_ref, w1_ref, b1_ref, w2_ref, b2_ref, w3_ref, b3_ref, o_ref):
    # fc1 + relu  (bf16 inputs, f32 accumulate)
    h1 = jnp.dot(x_ref[...], w1_ref[...], preferred_element_type=jnp.float32)
    h1 = jnp.maximum(h1 + b1_ref[...], 0.0)
    # fc2 + relu
    h2 = jnp.dot(h1.astype(jnp.bfloat16), w2_ref[...],
                 preferred_element_type=jnp.float32)
    h2 = jnp.maximum(h2 + b2_ref[...], 0.0)
    # fc3 (no activation), lane-dense padded output
    out = jnp.dot(h2.astype(jnp.bfloat16), w3_ref[...],
                  preferred_element_type=jnp.float32)
    o_ref[...] = (out + b3_ref[...]).astype(o_ref.dtype)


def _round_up(a, m):
    return (a + m - 1) // m * m


def simple_nn_forward(x, params, *, batch_tile=512):
    """x: any shape whose rows flatten to 784 (e.g. (B,1,28,28)). Returns (B,10) f32."""
    w1, b1, w2, b2, w3, b3 = params
    x2d = x.reshape(-1, 28 * 28)
    B = x2d.shape[0]

    # bf16 inputs/weights (halved HBM traffic, native MXU dtype); f32 biases.
    xb = x2d.astype(jnp.bfloat16)
    w1b = w1.astype(jnp.bfloat16)
    w2b = w2.astype(jnp.bfloat16)
    b1f = b1.astype(jnp.float32)
    b2f = b2.astype(jnp.float32)

    # Lane-dense output path: zero-pad fc3 from 10 to OUT_PAD output features.
    w3p = jnp.zeros((32, OUT_PAD), jnp.bfloat16).at[:, :10].set(w3.astype(jnp.bfloat16))
    b3p = jnp.zeros((1, OUT_PAD), jnp.float32).at[:, :10].set(b3.astype(jnp.float32))

    # Batch tile: multiple of 16 (bf16 sublane packing), capped at batch_tile.
    TB = min(batch_tile, _round_up(B, 16))
    Bp = _round_up(B, TB)
    if Bp != B:
        xb = jnp.pad(xb, ((0, Bp - B), (0, 0)))
    grid = (Bp // TB,)

    # VMEM budget: double-buffered x tile (lane-padded 784->896) + output tile
    # + resident weights/biases, plus headroom. Sized for v5e/v6e/v7x alike.
    x_bytes = 2 * TB * 896 * 2
    o_bytes = 2 * TB * OUT_PAD * 4
    w_bytes = 2 * (784 * 64 + 64 * 32 + 32 * OUT_PAD) * 2 + 2 * 3 * 8 * 128 * 4
    vmem_limit = min(48 * 1024 * 1024, x_bytes + o_bytes + w_bytes + 8 * 1024 * 1024)

    const = lambda shape: pl.BlockSpec(shape, lambda i: (0, 0))

    out_padded = pl.pallas_call(
        mlp_kernel,
        out_shape=jax.ShapeDtypeStruct((Bp, OUT_PAD), jnp.float32),
        grid=grid,
        in_specs=[
            pl.BlockSpec((TB, 784), lambda i: (i, 0)),   # x: tiled over batch
            const((784, 64)), const((1, 64)),            # fc1 (VMEM-resident)
            const((64, 32)),  const((1, 32)),            # fc2
            const((32, OUT_PAD)), const((1, OUT_PAD)),   # fc3 (padded)
        ],
        out_specs=pl.BlockSpec((TB, OUT_PAD), lambda i: (i, 0)),
        compiler_params=pltpu.CompilerParams(
            dimension_semantics=("parallel",),
            vmem_limit_bytes=vmem_limit,
        ),
    )(xb, w1b, b1f, w2b, b2f, w3p, b3p)

    return out_padded[:B, :10]


def init_params(key):
    """Deterministic init mimicking PyTorch nn.Linear default (U[-1/sqrt(fan_in), ...]).
    Weights are returned transposed: (in_features, out_features), float32."""
    dims = [(784, 64), (64, 32), (32, 10)]
    params = []
    for i, (fan_in, fan_out) in enumerate(dims):
        kw, kb = jax.random.split(jax.random.fold_in(key, i))
        bound = 1.0 / np.sqrt(fan_in)
        w = jax.random.uniform(kw, (fan_in, fan_out), jnp.float32, -bound, bound)
        b = jax.random.uniform(kb, (1, fan_out), jnp.float32, -bound, bound)
        params += [w, b]
    return tuple(params)


def reference_forward(x, params):
    """Pure f32 reference matching the PyTorch module semantics."""
    w1, b1, w2, b2, w3, b3 = params
    x2d = x.reshape(-1, 28 * 28).astype(jnp.float32)
    h1 = jnp.maximum(x2d @ w1 + b1, 0.0)
    h2 = jnp.maximum(h1 @ w2 + b2, 0.0)
    return h2 @ w3 + b3


if __name__ == "__main__":
    key = jax.random.PRNGKey(0)
    params = init_params(key)
    # MNIST-like input: batch=2, NCHW (2, 1, 28, 28); forward views it as (-1, 784)
    x = jax.random.normal(jax.random.fold_in(key, 99), (2, 1, 28, 28), jnp.float32)

    out = simple_nn_forward(x, params)
    jax.block_until_ready(out)

    ref = reference_forward(x, params)
    assert out.shape == (2, 10), out.shape
    # bf16 inputs/weights with f32 accumulation: relaxed tolerance vs f32 reference.
    np.testing.assert_allclose(np.asarray(out), np.asarray(ref), rtol=5e-2, atol=5e-2)
    print("KERNEL_OK")
</pallas_src>

<mosaic_0001>
module attributes {stable_mosaic.version = 11 : i64} {
  func.func @mlp_kernel(%arg0: i32, %arg1: memref<16x784xbf16, #tpu.memory_space<vmem>>, %arg2: memref<784x64xbf16, #tpu.memory_space<vmem>>, %arg3: memref<1x64xf32, #tpu.memory_space<vmem>>, %arg4: memref<64x32xbf16, #tpu.memory_space<vmem>>, %arg5: memref<1x32xf32, #tpu.memory_space<vmem>>, %arg6: memref<32x128xbf16, #tpu.memory_space<vmem>>, %arg7: memref<1x128xf32, #tpu.memory_space<vmem>>, %arg8: memref<16x128xf32, #tpu.memory_space<vmem>>) attributes {dimension_semantics = [#tpu.dimension_semantics<parallel>], iteration_bounds = array<i64: 1>, scalar_prefetch = 0 : i64, scratch_operands = 0 : i64, tpu.core_type = #tpu.core_type<tc>, window_params = [{transform_indices = @transform_0, window_bounds = array<i64: 16, 784>}, {pipeline_mode = #tpu.pipeline_mode<synchronous>, transform_indices = @transform_1, window_bounds = array<i64: 784, 64>}, {pipeline_mode = #tpu.pipeline_mode<synchronous>, transform_indices = @transform_2, window_bounds = array<i64: 1, 64>}, {pipeline_mode = #tpu.pipeline_mode<synchronous>, transform_indices = @transform_3, window_bounds = array<i64: 64, 32>}, {pipeline_mode = #tpu.pipeline_mode<synchronous>, transform_indices = @transform_4, window_bounds = array<i64: 1, 32>}, {pipeline_mode = #tpu.pipeline_mode<synchronous>, transform_indices = @transform_5, window_bounds = array<i64: 32, 128>}, {pipeline_mode = #tpu.pipeline_mode<synchronous>, transform_indices = @transform_6, window_bounds = array<i64: 1, 128>}, {transform_indices = @transform_7, window_bounds = array<i64: 16, 128>}]} {
    %c0 = arith.constant 0 : index
    %c0_0 = arith.constant 0 : index
    %0 = vector.load %arg1[%c0, %c0_0] : memref<16x784xbf16, #tpu.memory_space<vmem>>, vector<16x784xbf16>
    %c0_1 = arith.constant 0 : index
    %c0_2 = arith.constant 0 : index
    %1 = vector.load %arg2[%c0_1, %c0_2] : memref<784x64xbf16, #tpu.memory_space<vmem>>, vector<784x64xbf16>
    %cst = arith.constant dense<0.000000e+00> : vector<16x64xf32>
    %2 = tpu.matmul %0, %1, %cst {dimension_numbers = #tpu.dot_dimension_numbers<[1], [0], [0], [1], [0, 0, 1, 1], [], []>} : vector<16x784xbf16>, vector<784x64xbf16>, vector<16x64xf32> -> vector<16x64xf32>
    %c0_3 = arith.constant 0 : index
    %c0_4 = arith.constant 0 : index
    %3 = vector.load %arg3[%c0_3, %c0_4] : memref<1x64xf32, #tpu.memory_space<vmem>>, vector<1x64xf32>
    %4 = vector.broadcast %3 : vector<1x64xf32> to vector<16x64xf32>
    %5 = arith.addf %2, %4 : vector<16x64xf32>
    %cst_5 = arith.constant 0.000000e+00 : f32
    %6 = vector.broadcast %cst_5 : f32 to vector<16x64xf32>
    %7 = arith.maximumf %5, %6 : vector<16x64xf32>
    %8 = arith.truncf %7 : vector<16x64xf32> to vector<16x64xbf16>
    %c0_6 = arith.constant 0 : index
    %c0_7 = arith.constant 0 : index
    %9 = vector.load %arg4[%c0_6, %c0_7] : memref<64x32xbf16, #tpu.memory_space<vmem>>, vector<64x32xbf16>
    %cst_8 = arith.constant dense<0.000000e+00> : vector<16x32xf32>
    %10 = tpu.matmul %8, %9, %cst_8 {dimension_numbers = #tpu.dot_dimension_numbers<[1], [0], [0], [1], [0, 0, 1, 1], [], []>} : vector<16x64xbf16>, vector<64x32xbf16>, vector<16x32xf32> -> vector<16x32xf32>
    %c0_9 = arith.constant 0 : index
    %c0_10 = arith.constant 0 : index
    %11 = vector.load %arg5[%c0_9, %c0_10] : memref<1x32xf32, #tpu.memory_space<vmem>>, vector<1x32xf32>
    %12 = vector.broadcast %11 : vector<1x32xf32> to vector<16x32xf32>
    %13 = arith.addf %10, %12 : vector<16x32xf32>
    %cst_11 = arith.constant 0.000000e+00 : f32
    %14 = vector.broadcast %cst_11 : f32 to vector<16x32xf32>
    %15 = arith.maximumf %13, %14 : vector<16x32xf32>
    %16 = arith.truncf %15 : vector<16x32xf32> to vector<16x32xbf16>
    %c0_12 = arith.constant 0 : index
    %c0_13 = arith.constant 0 : index
    %17 = vector.load %arg6[%c0_12, %c0_13] : memref<32x128xbf16, #tpu.memory_space<vmem>>, vector<32x128xbf16>
    %cst_14 = arith.constant dense<0.000000e+00> : vector<16x128xf32>
    %18 = tpu.matmul %16, %17, %cst_14 {dimension_numbers = #tpu.dot_dimension_numbers<[1], [0], [0], [1], [0, 0, 1, 1], [], []>} : vector<16x32xbf16>, vector<32x128xbf16>, vector<16x128xf32> -> vector<16x128xf32>
    %c0_15 = arith.constant 0 : index
    %c0_16 = arith.constant 0 : index
    %19 = vector.load %arg7[%c0_15, %c0_16] : memref<1x128xf32, #tpu.memory_space<vmem>>, vector<1x128xf32>
    %20 = vector.broadcast %19 : vector<1x128xf32> to vector<16x128xf32>
    %21 = arith.addf %18, %20 : vector<16x128xf32>
    %c0_17 = arith.constant 0 : index
    %c0_18 = arith.constant 0 : index
    %22 = vector.load %arg8[%c0_17, %c0_18] : memref<16x128xf32, #tpu.memory_space<vmem>>, vector<16x128xf32>
    tpu.vector_store %arg8[%c0_17, %c0_18], %21 {strides = array<i32>} : memref<16x128xf32, #tpu.memory_space<vmem>>, vector<16x128xf32>,
    return
  }
  func.func @transform_0(%arg0: i32) -> (i32, i32) {
    %c0_i32 = arith.constant 0 : i32
    %c0_i32_0 = arith.constant 0 : i32
    return %arg0, %c0_i32 : i32, i32
  }
  func.func @transform_1(%arg0: i32) -> (i32, i32) {
    %c0_i32 = arith.constant 0 : i32
    %c0_i32_0 = arith.constant 0 : i32
    %c0_i32_1 = arith.constant 0 : i32
    return %c0_i32, %c0_i32_0 : i32, i32
  }
  func.func @transform_2(%arg0: i32) -> (i32, i32) {
    %c0_i32 = arith.constant 0 : i32
    %c0_i32_0 = arith.constant 0 : i32
    %c0_i32_1 = arith.constant 0 : i32
    return %c0_i32, %c0_i32_0 : i32, i32
  }
  func.func @transform_3(%arg0: i32) -> (i32, i32) {
    %c0_i32 = arith.constant 0 : i32
    %c0_i32_0 = arith.constant 0 : i32
    %c0_i32_1 = arith.constant 0 : i32
    return %c0_i32, %c0_i32_0 : i32, i32
  }
  func.func @transform_4(%arg0: i32) -> (i32, i32) {
    %c0_i32 = arith.constant 0 : i32
    %c0_i32_0 = arith.constant 0 : i32
    %c0_i32_1 = arith.constant 0 : i32
    return %c0_i32, %c0_i32_0 : i32, i32
  }
  func.func @transform_5(%arg0: i32) -> (i32, i32) {
    %c0_i32 = arith.constant 0 : i32
    %c0_i32_0 = arith.constant 0 : i32
    %c0_i32_1 = arith.constant 0 : i32
    return %c0_i32, %c0_i32_0 : i32, i32
  }
  func.func @transform_6(%arg0: i32) -> (i32, i32) {
    %c0_i32 = arith.constant 0 : i32
    %c0_i32_0 = arith.constant 0 : i32
    %c0_i32_1 = arith.constant 0 : i32
    return %c0_i32, %c0_i32_0 : i32, i32
  }
  func.func @transform_7(%arg0: i32) -> (i32, i32) {
    %c0_i32 = arith.constant 0 : i32
    %c0_i32_0 = arith.constant 0 : i32
    return %arg0, %c0_i32 : i32, i32
  }
}

</mosaic_0001>

<bundles_post_ra>
// kernel: tpu_custom_call.1
= control target key start
LH: loop header
LB: loop body
LE: loop exit
PB: predicated region body
PF: predicated region fallthrough
CT: control target
= control target key end

     0   :  { %v1078_v38 = vmov 0.0   ;;  %vm1079_vm0 = vmmov 0   ;;  %vm470_vm1 = vcmask 130048   ;;  %s1343_s0 = inlined_call_operand.vmem [shape: bf16[16,784], index: 0, kind: input, shape index: {}]   ;;  %s1344_s1 = inlined_call_operand.vmem [shape: bf16[784,64], index: 1, kind: input, shape index: {}]   ;;  %s1345_s2 = inlined_call_operand.vmem [shape: f32[1,64], index: 2, kind: input, shape index: {}]   ;;  %s1346_s3 = inlined_call_operand.vmem [shape: bf16[64,32], index: 3, kind: input, shape index: {}]   ;;  %s1347_s4 = inlined_call_operand.vmem [shape: f32[1,32], index: 4, kind: input, shape index: {}]   ;;  %s1348_s5 = inlined_call_operand.vmem [shape: bf16[32,128], index: 5, kind: input, shape index: {}]   ;;  %s1349_s6 = inlined_call_operand.vmem [shape: f32[1,128], index: 6, kind: input, shape index: {}]   ;;  %s1350_s7 = inlined_call_operand.hbm [shape: f32[16,128], index: 7, kind: output, shape index: {}]  }
   0x1   :  { %v989_v0 = vld [vmem:[%s1344_s1 + $0x40] sm:$0xff]   ;;  %v993_v4 = vld [vmem:[%s1344_s1 + $0x48] sm:$0xff]   ;;  %v997_v8 = vld [vmem:[%s1344_s1 + $0x50] sm:$0xff]  }
   0x2   :  { %v990_v1 = vld [vmem:[%s1344_s1] sm:$0xff]   ;;  %882 = vmatprep.subr.bf16.mxu0 %v989_v0  ;;  %v994_v5 = vld [vmem:[%s1344_s1 + $0x8] sm:$0xff]   ;;  %v998_v9 = vld [vmem:[%s1344_s1 + $0x10] sm:$0xff]  }
   0x3   :  { %v991_v2 = vld [vmem:[%s1344_s1 + $0xc0] sm:$0xff]   ;;  %883 = vmatpush3.bf16.msra.mxu0 %v990_v1  ;;  %v995_v6 = vld [vmem:[%s1344_s1 + $0xc8] sm:$0xff]   ;;  %v999_v10 = vld [vmem:[%s1344_s1 + $0xd0] sm:$0xff]  }
   0x4   :  { %v992_v3 = vld [vmem:[%s1344_s1 + $0x80] sm:$0xff]   ;;  %904 = vmatprep.subr.bf16.mxu1 %v991_v2  ;;  %884 = vmatprep.subr.bf16.mxu0 %v993_v4  ;;  %v996_v7 = vld [vmem:[%s1344_s1 + $0x88] sm:$0xff]   ;;  %v1000_v11 = vld [vmem:[%s1344_s1 + $0x90] sm:$0xff]  }
   0x5   :  { %905 = vmatpush3.bf16.msra.mxu1 %v992_v3  ;;  %v1001_v12 = vld [vmem:[%s1344_s1 + $0x58] sm:$0xff]   ;;  %v1005_v16 = vld [vmem:[%s1344_s1 + $0x60] sm:$0xff]   ;;  %v1009_v20 = vld [vmem:[%s1344_s1 + $0x68] sm:$0xff]  }
   0x6   :  { %906 = vmatprep.subr.bf16.mxu1 %v995_v6  ;;  %v1002_v13 = vld [vmem:[%s1344_s1 + $0x18] sm:$0xff]   ;;  %v1006_v17 = vld [vmem:[%s1344_s1 + $0x20] sm:$0xff]   ;;  %v1010_v21 = vld [vmem:[%s1344_s1 + $0x28] sm:$0xff]  }
   0x7   :  { %885 = vmatpush3.bf16.msra.mxu0 %v994_v5  ;;  %v1003_v14 = vld [vmem:[%s1344_s1 + $0xd8] sm:$0xff]   ;;  %v1007_v18 = vld [vmem:[%s1344_s1 + $0xe0] sm:$0xff]   ;;  %v1011_v22 = vld [vmem:[%s1344_s1 + $0xe8] sm:$0xff]  }
   0x8   :  { %886 = vmatprep.subr.bf16.mxu0 %v997_v8  ;;  %v1004_v15 = vld [vmem:[%s1344_s1 + $0x98] sm:$0xff]   ;;  %v1008_v19 = vld [vmem:[%s1344_s1 + $0xa0] sm:$0xff]   ;;  %v1012_v23 = vld [vmem:[%s1344_s1 + $0xa8] sm:$0xff]  }
   0x9   :  { %907 = vmatpush3.bf16.msra.mxu1 %v996_v7  ;;  %v1013_v24 = vld [vmem:[%s1344_s1 + $0x70] sm:$0xff]   ;;  %v1017_v28 = vld [vmem:[%s1344_s1 + $0x78] sm:$0xff]   ;;  %v1022_v32 = vld [vmem:[%s1343_s0 + $0x4] ss:$28 sps:$4 sm:$0xff]  }
   0xa   :  { %908 = vmatprep.subr.bf16.mxu1 %v999_v10  ;;  %v1014_v25 = vld [vmem:[%s1344_s1 + $0x30] sm:$0xff]   ;;  %v1018_v29 = vld [vmem:[%s1344_s1 + $0x38] sm:$0xff]   ;;  %506 = vmatprep.mubr.bf16.mxu0 %v1022_v32  ;;  %v1024_v34 = vld [vmem:[%s1344_s1 + $0x140] sm:$0xff]  }
   0xb   :  { %887 = vmatpush3.bf16.msra.mxu0 %v998_v9  ;;  %v1015_v26 = vld [vmem:[%s1344_s1 + $0xf0] sm:$0xff]   ;;  %v1019_v30 = vld [vmem:[%s1344_s1 + $0xf8] sm:$0xff]   ;;  %v1025_v35 = vld [vmem:[%s1343_s0 + $0x8] ss:$28 sps:$4 sm:$0xff]  }
   0xc   :  { %888 = vmatprep.subr.bf16.mxu0 %v1001_v12  ;;  %v1016_v27 = vld [vmem:[%s1344_s1 + $0xb0] sm:$0xff]   ;;  %v1020_v31 = vld [vmem:[%s1343_s0] ss:$28 sps:$4 sm:$0xff]   ;;  %v1027_v36 = vld [vmem:[%s1343_s0 + $0xc] ss:$28 sps:$4 sm:$0xff]  }
   0xd   :  { %909 = vmatpush3.bf16.msra.mxu1 %v1000_v11  ;;  %v1023_v33 = vld [vmem:[%s1344_s1 + $0xb8] sm:$0xff]   ;;  %v1028_v37 = vld [vmem:[%s1344_s1 + $0x100] sm:$0xff]   ;;  %547 = vmatprep.mubr.bf16.mxu1 %v1027_v36  ;;  %v1029_v39 = vld [vmem:[%s1344_s1 + $0x148] sm:$0xff]  }
   0xe   :  { %910 = vmatprep.subr.bf16.mxu1 %v1003_v14  ;;  %v1030_v40 = vld [vmem:[%s1344_s1 + $0x108] sm:$0xff]   ;;  %v1031_v41 = vld [vmem:[%s1344_s1 + $0x150] sm:$0xff]   ;;  %v1033_v43 = vld [vmem:[%s1344_s1 + $0x158] sm:$0xff]  }
   0xf   :  { %889 = vmatpush3.bf16.msra.mxu0 %v1002_v13  ;;  %v1032_v42 = vld [vmem:[%s1344_s1 + $0x110] sm:$0xff]   ;;  %v1034_v44 = vld [vmem:[%s1344_s1 + $0x118] sm:$0xff]   ;;  %v1035_v45 = vld [vmem:[%s1344_s1 + $0x160] sm:$0xff]  }
  0x10   :  { %890 = vmatprep.subr.bf16.mxu0 %v1005_v16  ;;  %v1036_v46 = vld [vmem:[%s1344_s1 + $0x120] sm:$0xff]   ;;  %v1037_v47 = vld [vmem:[%s1344_s1 + $0x168] sm:$0xff]   ;;  %v1046_v50 = vld [vmem:[%s1343_s0 + $0x14] ss:$28 sps:$4 sm:$0xff]  }
  0x11   :  { %911 = vmatpush3.bf16.msra.mxu1 %v1004_v15  ;;  %v1043_v48 = vld [vmem:[%s1344_s1 + $0x180] sm:$0xff]   ;;  %v1038_v49 = vld [vmem:[%s1344_s1 + $0x128] sm:$0xff]   ;;  %v1039_v51 = vld [vmem:[%s1344_s1 + $0x170] sm:$0xff]  }
  0x12   :  { %912 = vmatprep.subr.bf16.mxu1 %v1007_v18  ;;  %v1047_v52 = vld [vmem:[%s1343_s0 + $0x18] ss:$28 sps:$4 sm:$0xff]  }
  0x13   :  { %891 = vmatpush3.bf16.msra.mxu0 %v1006_v17  ;;  %v1040_v53 = vld [vmem:[%s1344_s1 + $0x130] sm:$0xff]  }
  0x14   :  { %892 = vmatprep.subr.bf16.mxu0 %v1009_v20 }
  0x15   :  { %913 = vmatpush3.bf16.msra.mxu1 %v1008_v19 }
  0x16   :  { %914 = vmatprep.subr.bf16.mxu1 %v1011_v22 }
  0x17   :  { %893 = vmatpush3.bf16.msra.mxu0 %v1010_v21 }
  0x18   :  { %894 = vmatprep.subr.bf16.mxu0 %v1013_v24 }
  0x19   :  { %915 = vmatpush3.bf16.msra.mxu1 %v1012_v23 }
  0x1a   :  { %916 = vmatprep.subr.bf16.mxu1 %v1015_v26 }
  0x1b   :  { %895 = vmatpush3.bf16.msra.mxu0 %v1014_v25 }
  0x1c   :  { %896 = vmatprep.subr.bf16.mxu0 %v1017_v28 }
  0x1d   :  { %917 = vmatpush3.bf16.msra.mxu1 %v1016_v27 }
  0x1e   :  { %918 = vmatprep.subr.bf16.mxu1 %v1019_v30 }
  0x1f   :  { %897 = vmatpush3.bf16.msra.mxu0 %v1018_v29 }
  0x20   :  { %926 = vmatprep.subr.bf16.mxu0 %v1024_v34 }
  0x21   :  { %919 = vmatpush3.bf16.msra.mxu1 %v1023_v33 }
  0x22   :  { %507 = vmatmul.mubr.bf16.vlgmr.msra.gmra.mrb[0].mxu0 %v1020_v31  ;;  %958 = vmatprep.subr.bf16.mxu1 %v1078_v38 }
  0x23   :  { %927 = vmatpush3.bf16.msra.mxu0 %v1028_v37  ;;  %588 = vmatprep.mubr.bf16.mxu0 %v1046_v50 }
  0x24   :  { %548 = vmatmul.mubr.bf16.vlgmr.msra.gmra.mrb[0].mxu1 %v1025_v35  ;;  %928 = vmatprep.subr.bf16.mxu0 %v1029_v39 }
  0x25   :  { %960 = vmatprep.mubr.msk.bf16.mxu1 %vm1079_vm0, %v1078_v38  ;;  %959 = vmatpush3.bf16.msra.mxu1 %v1043_v48 }
  0x26   :  { %964 = vmatprep.subr.bf16.mxu1 %v1078_v38 }
  0x27   :  { %929 = vmatpush3.bf16.msra.mxu0 %v1030_v40 }
  0x28   :  { %930 = vmatprep.subr.bf16.mxu0 %v1031_v41 }
  0x2b   :  { %931 = vmatpush3.bf16.msra.mxu0 %v1032_v42 }
  0x2c   :  { %932 = vmatprep.subr.bf16.mxu0 %v1033_v43  ;;  %961 = vmatmul.mubr.msk.bf16.vlgmr.msra.gmra.mrb[4].mxu1 %vm470_vm1, %v1047_v52 }
  0x2d   :  { %972 = vmatprep.mubr.msk.bf16.mxu1 %vm1079_vm0, %v1078_v38 }
  0x2f   :  { %933 = vmatpush3.bf16.msra.mxu0 %v1034_v44 }
  0x30   :  { %934 = vmatprep.subr.bf16.mxu0 %v1035_v45 }
  0x33   :  { %935 = vmatpush3.bf16.msra.mxu0 %v1036_v46 }
  0x34   :  { %936 = vmatprep.subr.bf16.mxu0 %v1037_v47 }
  0x37   :  { %937 = vmatpush3.bf16.msra.mxu0 %v1038_v49 }
  0x38   :  { %12 = vsyncpa [#allocation3], 0  ;;  %938 = vmatprep.subr.bf16.mxu0 %v1039_v51  ;;  %v1041_v54 = vld [vmem:[%s1344_s1 + $0x178] sm:$0xff]   ;;  %v1044_v56 = vld [vmem:[%s1343_s0 + $0x10] ss:$28 sps:$4 sm:$0xff]   ;;  %vm680_vm2 = vcmask 523264  }
  0x39   :  { %v1042_v55 = vld [vmem:[%s1344_s1 + $0x138] sm:$0xff]   ;;  %v1048_v57 = vld [vmem:[%s1346_s3] sm:$0xff]   ;;  %v1049_v58 = vld [vmem:[%s1346_s3 + $0x8] sm:$0xff]   ;;  %vm751_vm3 = vcmask 261120  }
  0x3a   :  { %965 = vmatpush3.bf16.msra.mxu1 %v1048_v57  ;;  %v1050_v59 = vld [vmem:[%s1346_s3 + $0x10] sm:$0xff]   ;;  %v1051_v60 = vld [vmem:[%s1346_s3 + $0x18] sm:$0xff]   ;;  %v814_v62 = vld [vmem:[%s1345_s2] ss:$0 sm:$0xff] }
  0x3b   :  { %939 = vmatpush3.bf16.msra.mxu0 %v1040_v53  ;;  %966 = vmatprep.subr.bf16.mxu1 %v1078_v38  ;;  %v1052_v31 = vld [vmem:[%s1348_s5] sm:$0xff]   ;;  %v1053_v32 = vld [vmem:[%s1348_s5 + $0x8] sm:$0xff]   ;;  %s1080_s5 = smov [#allocation2]  }
  0x3c   :  { %940 = vmatprep.subr.bf16.mxu0 %v1041_v54  ;;  %v872_v33 = vld [vmem:[%s1347_s4] ss:$0 sm:$0xff]  ;;  %s803_s12 = sshll.u32 %s1080_s5, 4  ;;  %s804_s12 = int_to_ptr.vmem [resolvable:$true] %s803_s12 }
  0x3d   :  { %s1054_s4 = scalar_lea.vmem %s804_s12, 256  ;;  %p1059_p1 = scmp.lt.s32.totalorder %s804_s12, %s804_s12 }
  0x3e   :  { %967 = vmatpush3.bf16.msra.mxu1 %v1049_v58  ;;  %p1055_p0 = scmp.ne.s32.totalorder %s804_s12, %s1054_s4  ;;  %p1060_p2 = scmp.lt.s32.totalorder %s1054_s4, %s1054_s4 }
  0x3f   :  { %941 = vmatpush3.bf16.msra.mxu0 %v1042_v55  ;;  %968 = vmatprep.subr.bf16.mxu1 %v1078_v38 }
  0x40   :  { %p1061_p3 = por %p1060_p2, %p1059_p1 }
  0x42   :  { %589 = vmatmul.mubr.bf16.vlgmr.msra.gmra.mrb[4].mxu0 %v1044_v56  ;;  %969 = vmatpush3.bf16.msra.mxu1 %v1050_v59  ;;  %p1062_p4 = pnand %p1061_p3, %p1055_p0 }
  0x43   :  { %970 = vmatprep.subr.bf16.mxu1 %v1078_v38 }
  0x46   :  { %971 = vmatpush3.bf16.msra.mxu1 %v1051_v60 }
  0x47   :  { %976 = vmatprep.subr.bf16.mxu1 %v1078_v38 }
  0xf5   :  { %v898_v61 = vpop.f32.mrb[0].mxu0 }
  0xf6   :  { %v899_v63 = vpop.f32.mrb[1].mxu0 }
  0xf7   :  { %v900_v0 = vadd.f32 %v899_v63, %v898_v61  ;;  %v901_v1 = vpop.f32.mrb[2].mxu0  ;;  %v920_v2 = vpop.f32.mrb[0].mxu1 }
  0xf8   :  { %v902_v3 = vpop.f32.mrb[3].mxu0  ;;  %v921_v6 = vpop.f32.mrb[1].mxu1 }
  0xf9   :  { %v509_v4 = vadd.f32 %v900_v0, %v814_v62  ;;  %v903_v5 = vadd.f32 %v902_v3, %v901_v1  ;;  %v922_v7 = vadd.f32 %v921_v6, %v920_v2  ;;  %v923_v8 = vpop.f32.mrb[2].mxu1 }
  0xfa   :  { %v924_v10 = vpop.f32.mrb[3].mxu1 }
  0xfb   :  { %v512_v9 = vadd.f32 %v903_v5, %v814_v62  ;;  %v550_v11 = vadd.f32 %v922_v7, %v509_v4  ;;  %v925_v12 = vadd.f32 %v924_v10, %v923_v8 }
  0xfd   :  { %v553_v13 = vadd.f32 %v925_v12, %v512_v9 }
  0xff   :  { %v631_v14 = vpop.f32.mrb[4].mxu1 }
 0x100   :  { %v962_v15 = vpop.f32.mrb[5].mxu1 }
 0x101   :  { %v634_v16 = vpop.f32.mrb[6].mxu1 }
 0x102   :  { %v963_v17 = vpop.f32.mrb[7].mxu1 }
 0x115   :  { %v942_v18 = vpop.f32.mrb[4].mxu0 }
 0x116   :  { %v943_v19 = vpop.f32.mrb[5].mxu0 }
 0x117   :  { %v944_v20 = vadd.f32 %v943_v19, %v942_v18  ;;  %v945_v21 = vpop.f32.mrb[6].mxu0 }
 0x118   :  { %v946_v22 = vpop.f32.mrb[7].mxu0 }
 0x119   :  { %v591_v23 = vadd.f32 %v944_v20, %v550_v11  ;;  %v947_v24 = vadd.f32 %v946_v22, %v945_v21 }
 0x11b   :  { %v632_v25 = vadd.f32 %v631_v14, %v591_v23  ;;  %v594_v26 = vadd.f32 %v947_v24, %v553_v13 }
 0x11d   :  { %v635_v27 = vadd.f32 %v634_v16, %v594_v26  ;;  %v638_v28 = vmax.f32 %v632_v25, 0.0 }
 0x11f   :  { %v639_v29 = vmax.f32 %v635_v27, 0.0 }
 0x121   :  { %v640_v30 = vpack.c.bf16 %v639_v29, %v638_v28 }
 0x123   :  { %973 = vmatmul.mubr.msk.bf16.vlgmr.msra.gmra.mrb[8].mxu1 %vm680_vm2, %v640_v30 }
 0x124   :  { %980 = vmatprep.mubr.msk.bf16.mxu1 %vm1079_vm0, %v1078_v38  ;;  %977 = vmatpush3.bf16.msra.mxu1 %v1052_v31 }
 0x125   :  { %978 = vmatprep.subr.bf16.mxu1 %v1078_v38  ;;  %v878_v38 = vld [vmem:[%s1349_s6] ss:$0 sm:$0xff] }
 0x128   :  { %979 = vmatpush3.bf16.msra.mxu1 %v1053_v32 }
 0x1f6   :  { %v718_v34 = vpop.f32.mrb[8].mxu1 }
 0x1f7   :  { %v719_v35 = vadd.f32 %v872_v33, %v718_v34  ;;  %v974_v36 = vpop.f32.mrb[9].mxu1 }
 0x1f8   :  { %v721_v37 = vpop.f32.mrb[10].mxu1 }
 0x1f9   :  { %v722_v39 = vadd.f32 %v872_v33, %v721_v37  ;;  %v975_v40 = vpop.f32.mrb[11].mxu1  ;;  %v725_v41 = vmax.f32 %v719_v35, 0.0 }
 0x1fb   :  { %v726_v42 = vmax.f32 %v722_v39, 0.0 }
 0x1fd   :  { %v727_v43 = vpack.c.bf16 %v726_v42, %v725_v41 }
 0x1ff   :  { %981 = vmatmul.mubr.msk.bf16.vlgmr.msra.gmra.mrb[12].mxu1 %vm751_vm3, %v727_v43 }
 0x2d2   :  { %v789_v44 = vpop.f32.mrb[12].mxu1 }
 0x2d3   :  { %v790_v45 = vadd.f32 %v878_v38, %v789_v44  ;;  %v982_v46 = vpop.f32.mrb[13].mxu1 }
 0x2d4   :  { %v792_v47 = vpop.f32.mrb[14].mxu1 }
 0x2d5   :  { %796 = vst [vmem:[#allocation2] sm:$0xff] %v790_v45  ;;  %v793_v48 = vadd.f32 %v878_v38, %v792_v47  ;;  %v983_v49 = vpop.f32.mrb[15].mxu1 }
 0x2d7   :  { %797 = vst [vmem:[#allocation2 + $0x8] sm:$0xff] %v793_v48 }
 0x2d8   :  { %1065 = shalt.err (!%p1062_p4)
}
 0x2d9   :  { %s1066_s14 = scalar_lea.hbm %s1350_s7, 256 }
 0x2da   :  { %p1067_p5 = scmp.ne.s32.totalorder %s1350_s7, %s1066_s14  ;;  %p1070_p6 = scmp.lt.u32.totalorder %s1066_s14, %s1350_s7 }
 0x2dc   :  { %p1072_p7 = pnand %p1070_p6, %p1067_p5 }
 0x2de   :  { %1075 = shalt.err (!%p1072_p7)
}
 0x2df   :  { %s1081_s19 = smov 128   ;;  %s1082_s20 = smov 8  }
 0x2e0   :  { %809 = dma.vmem_to_hbm [thread:$0]  %s804_s12, 256, %s1350_s7, [#allocation3], %s1081_s19, %s1081_s19, %s1082_s20  }
 0x2e1   :  { %1076 = dma.done.wait [#allocation3], 256  }
 0x2e2   :  { %1077 = vsyncadd [#allocation3], 4294967040 }
 0x2e3   :  { %813 = vsyncpa [#allocation3], 1 }

</bundles_post_ra>
